<compile_context>
chip_gen: v7x
topology: tpu7x:2x2x1
jax: 0.10.0
libtpu: 0.0.40
codegen_flags: <defaults>
</compile_context>

<pallas_src>
import jax
import jax.numpy as jnp
from jax.experimental import pallas as pl
from jax.experimental.pallas import tpu as pltpu


def _round_up(a, m):
    return (a + m - 1) // m * m


def _highway_fused_kernel(x_ref, w_ref, b_ref, o_ref):
    """x_ref: [tn, Dp] (input dtype); w_ref: [L, Dp, 2Dp] bf16; b_ref: [L, 1, 2Dp] f32."""
    num_layers, d_pad, _ = w_ref.shape
    x = x_ref[...].astype(jnp.float32)
    # Static unroll over layers; x stays in registers/VMEM the whole time.
    for l in range(num_layers):
        w = w_ref[l]                     # [Dp, 2Dp] bf16 (resident)
        b = b_ref[l]                     # [1, 2Dp]  f32
        proj = jnp.dot(x.astype(w.dtype), w,
                       preferred_element_type=jnp.float32) + b
        nonlinear = jnp.maximum(proj[:, :d_pad], 0.0)      # relu half
        gate = jax.nn.sigmoid(proj[:, d_pad:])             # gate half
        # gate*x + (1-gate)*nl  ==  nl + gate*(x - nl)   (fewer VPU ops)
        x = nonlinear + gate * (x - nonlinear)
    o_ref[...] = x.astype(o_ref.dtype)


def prepare_highway_params(weights, biases, *, weight_dtype=jnp.bfloat16):
    """One-time prep: transpose, concat halves, pad D->multiple of 128, stack, cast.

    weights[i]: [2D, D] (PyTorch nn.Linear layout), biases[i]: [2D]
    Returns w_stacked [L, Dp, 2Dp] (weight_dtype), b_stacked [L, 1, 2Dp] (f32).
    Zero padding keeps padded lanes exactly zero through every layer
    (relu(0)=0, sigmoid(0)*0 + (1-sigmoid(0))*0 = 0), so results are exact.
    """
    d = weights[0].shape[1]
    d_pad = _round_up(max(d, 128), 128)
    w_stack, b_stack = [], []
    for w, b in zip(weights, biases):
        assert w.shape == (2 * d, d) and b.shape == (2 * d,)
        wh = jnp.transpose(w[:d, :])     # [D, D] nonlinear half, x @ Wh
        wg = jnp.transpose(w[d:, :])     # [D, D] gate half,      x @ Wg
        wh_p = jnp.zeros((d_pad, d_pad), jnp.float32).at[:d, :d].set(wh)
        wg_p = jnp.zeros((d_pad, d_pad), jnp.float32).at[:d, :d].set(wg)
        w_stack.append(jnp.concatenate([wh_p, wg_p], axis=1))   # [Dp, 2Dp]
        b_full = jnp.zeros((2 * d_pad,), jnp.float32)
        b_full = b_full.at[:d].set(b[:d]).at[d_pad:d_pad + d].set(b[d:])
        b_stack.append(b_full.reshape(1, 2 * d_pad))
    w_stacked = jnp.stack(w_stack).astype(weight_dtype)          # [L, Dp, 2Dp]
    b_stacked = jnp.stack(b_stack)                               # [L, 1, 2Dp] f32
    return w_stacked, b_stacked


def highway_forward(x, w_stacked, b_stacked, *, tile_rows=512):
    """Fused Highway forward. x: [..., D]; params from prepare_highway_params."""
    d = x.shape[-1]
    num_layers, d_pad, two_d_pad = w_stacked.shape
    lead = x.shape[:-1]
    x2 = x.reshape(-1, d)
    n = x2.shape[0]

    # Pad rows so any N works (sublane multiple of 8, then multiple of the tile).
    n_pad = _round_up(max(n, 8), 8)
    tn = min(tile_rows, n_pad)
    n_pad = _round_up(n_pad, tn)

    x_p = jnp.zeros((n_pad, d_pad), x.dtype).at[:n, :d].set(x2)

    out = pl.pallas_call(
        _highway_fused_kernel,
        out_shape=jax.ShapeDtypeStruct((n_pad, d_pad), x.dtype),
        grid_spec=pltpu.PrefetchScalarGridSpec(
            num_scalar_prefetch=0,
            grid=(n_pad // tn,),
            in_specs=[
                pl.BlockSpec((tn, d_pad), lambda i: (i, 0)),                 # x tile
                pl.BlockSpec((num_layers, d_pad, two_d_pad),
                             lambda i: (0, 0, 0)),                           # all weights (resident)
                pl.BlockSpec((num_layers, 1, two_d_pad),
                             lambda i: (0, 0, 0)),                           # all biases (resident)
            ],
            out_specs=pl.BlockSpec((tn, d_pad), lambda i: (i, 0)),
        ),
        compiler_params=pltpu.CompilerParams(
            dimension_semantics=("parallel",),
            vmem_limit_bytes=48 * 1024 * 1024,   # under v7x's 64 MiB physical VMEM
        ),
    )(x_p, w_stacked, b_stacked)

    return out[:n, :d].reshape(*lead, d)


def init_highway_params(key, input_dim, num_layers):
    """Deterministic init matching nn.Linear defaults + bias[input_dim:] = 1."""
    weights, biases = [], []
    bound = 1.0 / jnp.sqrt(jnp.float32(input_dim))
    for _ in range(num_layers):
        k_w, k_b, key = jax.random.split(key, 3)
        w = jax.random.uniform(
            k_w, (2 * input_dim, input_dim), jnp.float32, -bound, bound)
        b = jax.random.uniform(
            k_b, (2 * input_dim,), jnp.float32, -bound, bound)
        b = b.at[input_dim:].set(1.0)   # gate bias initialized to 1
        weights.append(w)
        biases.append(b)
    return weights, biases


def highway_reference(x, weights, biases):
    """Pure-JAX f32 reference matching the PyTorch module."""
    cur = x
    for w, b in zip(weights, biases):
        proj = cur @ w.T + b
        d = cur.shape[-1]
        nonlinear, gate = proj[..., :d], proj[..., d:]
        nonlinear = jnp.maximum(nonlinear, 0.0)
        gate = jax.nn.sigmoid(gate)
        cur = gate * cur + (1.0 - gate) * nonlinear
    return cur


if __name__ == "__main__":
    input_dim = 32
    num_layers = 2
    batch, seq = 2, 8          # Highway acts on the last dim; leading dims flatten

    key = jax.random.PRNGKey(0)
    k_x, k_p = jax.random.split(key)
    x = jax.random.normal(k_x, (batch, seq, input_dim), jnp.float32)
    weights, biases = init_highway_params(k_p, input_dim, num_layers)

    # One-time parameter preparation (hoisted out of the forward path).
    w_stacked, b_stacked = prepare_highway_params(weights, biases)

    out = highway_forward(x, w_stacked, b_stacked)
    out = jax.block_until_ready(out)

    ref = highway_reference(x, weights, biases)
    assert out.shape == ref.shape == (batch, seq, input_dim)
    # bf16 MXU operands (f32 accumulation + f32 elementwise) -> loosened tolerance.
    assert jnp.allclose(out, ref, atol=5e-2, rtol=5e-2), "mismatch vs reference"

    print("KERNEL_OK")
</pallas_src>

<mosaic_0001>
module attributes {stable_mosaic.version = 11 : i64} {
  func.func @_highway_fused_kernel(%arg0: i32, %arg1: memref<16x128xf32, #tpu.memory_space<vmem>>, %arg2: memref<2x128x256xbf16, #tpu.memory_space<vmem>>, %arg3: memref<2x1x256xf32, #tpu.memory_space<vmem>>, %arg4: memref<16x128xf32, #tpu.memory_space<vmem>>) attributes {dimension_semantics = [#tpu.dimension_semantics<parallel>], iteration_bounds = array<i64: 1>, scalar_prefetch = 0 : i64, scratch_operands = 0 : i64, tpu.core_type = #tpu.core_type<tc>, window_params = [{transform_indices = @transform_0, window_bounds = array<i64: 16, 128>}, {pipeline_mode = #tpu.pipeline_mode<synchronous>, transform_indices = @transform_1, window_bounds = array<i64: 2, 128, 256>}, {pipeline_mode = #tpu.pipeline_mode<synchronous>, transform_indices = @transform_2, window_bounds = array<i64: 2, 1, 256>}, {transform_indices = @transform_3, window_bounds = array<i64: 16, 128>}]} {
    %c0 = arith.constant 0 : index
    %c0_0 = arith.constant 0 : index
    %0 = vector.load %arg1[%c0, %c0_0] : memref<16x128xf32, #tpu.memory_space<vmem>>, vector<16x128xf32>
    %c0_1 = arith.constant 0 : index
    %c0_2 = arith.constant 0 : index
    %c0_3 = arith.constant 0 : index
    %1 = vector.load %arg2[%c0_1, %c0_2, %c0_3] : memref<2x128x256xbf16, #tpu.memory_space<vmem>>, vector<1x128x256xbf16>
    %2 = vector.shape_cast %1 : vector<1x128x256xbf16> to vector<128x256xbf16>
    %c0_4 = arith.constant 0 : index
    %c0_5 = arith.constant 0 : index
    %c0_6 = arith.constant 0 : index
    %3 = vector.load %arg3[%c0_4, %c0_5, %c0_6] : memref<2x1x256xf32, #tpu.memory_space<vmem>>, vector<1x1x256xf32>
    %4 = vector.shape_cast %3 : vector<1x1x256xf32> to vector<1x256xf32>
    %5 = arith.truncf %0 : vector<16x128xf32> to vector<16x128xbf16>
    %cst = arith.constant dense<0.000000e+00> : vector<16x256xf32>
    %6 = tpu.matmul %5, %2, %cst {dimension_numbers = #tpu.dot_dimension_numbers<[1], [0], [0], [1], [0, 0, 1, 1], [], []>} : vector<16x128xbf16>, vector<128x256xbf16>, vector<16x256xf32> -> vector<16x256xf32>
    %7 = vector.broadcast %4 : vector<1x256xf32> to vector<16x256xf32>
    %8 = arith.addf %6, %7 : vector<16x256xf32>
    %9 = vector.extract_strided_slice %8 {offsets = [0, 0], sizes = [16, 128], strides = [1, 1]} : vector<16x256xf32> to vector<16x128xf32>
    %cst_7 = arith.constant 0.000000e+00 : f32
    %10 = vector.broadcast %cst_7 : f32 to vector<16x128xf32>
    %11 = arith.maximumf %9, %10 : vector<16x128xf32>
    %12 = vector.extract_strided_slice %8 {offsets = [0, 128], sizes = [16, 128], strides = [1, 1]} : vector<16x256xf32> to vector<16x128xf32>
    %13 = arith.negf %12 : vector<16x128xf32>
    %14 = math.exp %13 : vector<16x128xf32>
    %cst_8 = arith.constant 1.000000e+00 : f32
    %15 = vector.broadcast %cst_8 : f32 to vector<16x128xf32>
    %16 = arith.addf %15, %14 : vector<16x128xf32>
    %17 = arith.divf %15, %16 : vector<16x128xf32>
    %18 = arith.subf %0, %11 : vector<16x128xf32>
    %19 = arith.mulf %17, %18 : vector<16x128xf32>
    %20 = arith.addf %11, %19 : vector<16x128xf32>
    %c1 = arith.constant 1 : index
    %c0_9 = arith.constant 0 : index
    %c0_10 = arith.constant 0 : index
    %21 = vector.load %arg2[%c1, %c0_9, %c0_10] : memref<2x128x256xbf16, #tpu.memory_space<vmem>>, vector<1x128x256xbf16>
    %22 = vector.shape_cast %21 : vector<1x128x256xbf16> to vector<128x256xbf16>
    %c1_11 = arith.constant 1 : index
    %c0_12 = arith.constant 0 : index
    %c0_13 = arith.constant 0 : index
    %23 = vector.load %arg3[%c1_11, %c0_12, %c0_13] : memref<2x1x256xf32, #tpu.memory_space<vmem>>, vector<1x1x256xf32>
    %24 = vector.shape_cast %23 : vector<1x1x256xf32> to vector<1x256xf32>
    %25 = arith.truncf %20 : vector<16x128xf32> to vector<16x128xbf16>
    %cst_14 = arith.constant dense<0.000000e+00> : vector<16x256xf32>
    %26 = tpu.matmul %25, %22, %cst_14 {dimension_numbers = #tpu.dot_dimension_numbers<[1], [0], [0], [1], [0, 0, 1, 1], [], []>} : vector<16x128xbf16>, vector<128x256xbf16>, vector<16x256xf32> -> vector<16x256xf32>
    %27 = vector.broadcast %24 : vector<1x256xf32> to vector<16x256xf32>
    %28 = arith.addf %26, %27 : vector<16x256xf32>
    %29 = vector.extract_strided_slice %28 {offsets = [0, 0], sizes = [16, 128], strides = [1, 1]} : vector<16x256xf32> to vector<16x128xf32>
    %cst_15 = arith.constant 0.000000e+00 : f32
    %30 = vector.broadcast %cst_15 : f32 to vector<16x128xf32>
    %31 = arith.maximumf %29, %30 : vector<16x128xf32>
    %32 = vector.extract_strided_slice %28 {offsets = [0, 128], sizes = [16, 128], strides = [1, 1]} : vector<16x256xf32> to vector<16x128xf32>
    %33 = arith.negf %32 : vector<16x128xf32>
    %34 = math.exp %33 : vector<16x128xf32>
    %cst_16 = arith.constant 1.000000e+00 : f32
    %35 = vector.broadcast %cst_16 : f32 to vector<16x128xf32>
    %36 = arith.addf %35, %34 : vector<16x128xf32>
    %37 = arith.divf %35, %36 : vector<16x128xf32>
    %38 = arith.subf %20, %31 : vector<16x128xf32>
    %39 = arith.mulf %37, %38 : vector<16x128xf32>
    %40 = arith.addf %31, %39 : vector<16x128xf32>
    %c0_17 = arith.constant 0 : index
    %c0_18 = arith.constant 0 : index
    %41 = vector.load %arg4[%c0_17, %c0_18] : memref<16x128xf32, #tpu.memory_space<vmem>>, vector<16x128xf32>
    tpu.vector_store %arg4[%c0_17, %c0_18], %40 {strides = array<i32>} : memref<16x128xf32, #tpu.memory_space<vmem>>, vector<16x128xf32>,
    return
  }
  func.func @transform_0(%arg0: i32) -> (i32, i32) {
    %c0_i32 = arith.constant 0 : i32
    %c0_i32_0 = arith.constant 0 : i32
    return %arg0, %c0_i32 : i32, i32
  }
  func.func @transform_1(%arg0: i32) -> (i32, i32, i32) {
    %c0_i32 = arith.constant 0 : i32
    %c0_i32_0 = arith.constant 0 : i32
    %c0_i32_1 = arith.constant 0 : i32
    %c0_i32_2 = arith.constant 0 : i32
    return %c0_i32, %c0_i32_0, %c0_i32_1 : i32, i32, i32
  }
  func.func @transform_2(%arg0: i32) -> (i32, i32, i32) {
    %c0_i32 = arith.constant 0 : i32
    %c0_i32_0 = arith.constant 0 : i32
    %c0_i32_1 = arith.constant 0 : i32
    %c0_i32_2 = arith.constant 0 : i32
    return %c0_i32, %c0_i32_0, %c0_i32_1 : i32, i32, i32
  }
  func.func @transform_3(%arg0: i32) -> (i32, i32) {
    %c0_i32 = arith.constant 0 : i32
    %c0_i32_0 = arith.constant 0 : i32
    return %arg0, %c0_i32 : i32, i32
  }
}

</mosaic_0001>

<bundles_post_ra>
// kernel: tpu_custom_call.1
= control target key start
LH: loop header
LB: loop body
LE: loop exit
PB: predicated region body
PF: predicated region fallthrough
CT: control target
= control target key end

     0   :  { %8 = vsyncpa [#allocation3], 0  ;;  %s676_s0 = inlined_call_operand.hbm [shape: f32[16,128], index: 0, kind: input, shape index: {}]   ;;  %s677_s1 = inlined_call_operand.hbm [shape: bf16[2,128,256], index: 1, kind: input, shape index: {}]   ;;  %s678_s2 = inlined_call_operand.vmem [shape: f32[2,1,256], index: 2, kind: input, shape index: {}]   ;;  %s679_s3 = inlined_call_operand.hbm [shape: f32[16,128], index: 3, kind: output, shape index: {}]  }
   0x1   :  { %9 = vsyncpa [#allocation6], 0 }
   0x2   :  { %10 = vsyncpa [#allocation4], 0  ;;  %s591_s12 = smov [#allocation2]   ;;  %s519_s16 = scalar_lea.hbm %s676_s0, 256 }
   0x3   :  { %s16_s13 = sshll.u32 %s591_s12, 4  ;;  %p520_p0 = scmp.ne.s32.totalorder %s676_s0, %s519_s16  ;;  %s17_s13 = int_to_ptr.vmem [resolvable:$true] %s16_s13 }
   0x4   :  { %p523_p1 = scmp.lt.u32.totalorder %s519_s16, %s676_s0 }
   0x6   :  { %p525_p2 = pnand %p523_p1, %p520_p0 }
   0x8   :  { %528 = shalt.err (!%p525_p2)
}
   0x9   :  { %s529_s21 = scalar_lea.vmem %s17_s13, 256  ;;  %p534_p4 = scmp.lt.s32.totalorder %s17_s13, %s17_s13 }
   0xa   :  { %p530_p3 = scmp.ne.s32.totalorder %s17_s13, %s529_s21  ;;  %p535_p5 = scmp.lt.s32.totalorder %s529_s21, %s529_s21 }
   0xc   :  { %p536_p6 = por %p535_p5, %p534_p4 }
   0xe   :  { %p537_p7 = pnand %p536_p6, %p530_p3 }
  0x10   :  { %540 = shalt.err (!%p537_p7)
}
  0x11   :  { %s592_s22 = smov 128   ;;  %s593_s23 = smov 8  }
  0x12   :  { %22 = dma.hbm_to_vmem [thread:$0]  %s676_s0, 256, %s17_s13, [#allocation3], %s592_s22, %s592_s22, %s593_s23  }
  0x13   :  { %s594_s26 = smov [#allocation5]   ;;  %s541_s30 = scalar_lea.hbm %s677_s1, 4096 }
  0x14   :  { %s28_s27 = sshll.u32 %s594_s26, 4  ;;  %p542_p8 = scmp.ne.s32.totalorder %s677_s1, %s541_s30  ;;  %s29_s27 = int_to_ptr.vmem [resolvable:$true] %s28_s27 }
  0x15   :  { %p545_p9 = scmp.lt.u32.totalorder %s541_s30, %s677_s1 }
  0x17   :  { %p547_p10 = pnand %p545_p9, %p542_p8 }
  0x19   :  { %550 = shalt.err (!%p547_p10)
}
  0x1a   :  { %s551_s8 = scalar_lea.vmem %s29_s27, 4096  ;;  %p556_p12 = scmp.lt.s32.totalorder %s29_s27, %s29_s27 }
  0x1b   :  { %p552_p11 = scmp.ne.s32.totalorder %s29_s27, %s551_s8  ;;  %p557_p13 = scmp.lt.s32.totalorder %s551_s8, %s551_s8 }
  0x1d   :  { %p558_p0 = por %p557_p13, %p556_p12 }
  0x1f   :  { %p559_p1 = pnand %p558_p0, %p552_p11 }
  0x21   :  { %562 = shalt.err (!%p559_p1)
}
  0x22   :  { %34 = dma.hbm_to_vmem [thread:$0]  %s677_s1, 4096, %s29_s27, [#allocation6], %s592_s22, %s592_s22, %s593_s23  }
  0x23   :  { %585 = dma.done.wait [#allocation3], 256  }
  0x24   :  { %586 = vsyncadd [#allocation3], 4294967040 }
  0x25   :  { %587 = dma.done.wait [#allocation6], 4096  }
  0x26   :  { %588 = vsyncadd [#allocation6], 4294963200  ;;  %v595_v0 = vmov 0   ;;  %v455_v1 = vld [vmem:[#allocation5 + $0x4] ss:$8 sps:$4 sm:$0xff]   ;;  %v647_v17 = vld [vmem:[#allocation2] sm:$0xff]  ;;  %v65_v36 = vlaneseq }
  0x27   :  { %187 = vmatprep.mubr.bf16.mxu0 %v595_v0  ;;  %361 = vmatprep.mubr.bf16.mxu1 %v595_v0  ;;  %v457_v2 = vld [vmem:[#allocation5] ss:$8 sps:$4 sm:$0xff]   ;;  %v458_v3 = vld [vmem:[#allocation5 + $0x14] ss:$8 sps:$4 sm:$0xff]   ;;  %v460_v4 = vld [vmem:[#allocation5 + $0x10] ss:$8 sps:$4 sm:$0xff]  }
  0x28   :  { %155 = vmatprep.subr.bf16.mxu0 %v455_v1  ;;  %v461_v5 = vld [vmem:[#allocation5 + $0x24] ss:$8 sps:$4 sm:$0xff]   ;;  %v463_v6 = vld [vmem:[#allocation5 + $0x20] ss:$8 sps:$4 sm:$0xff]   ;;  %v464_v7 = vld [vmem:[#allocation5 + $0x34] ss:$8 sps:$4 sm:$0xff]  }
  0x29   :  { %156 = vmatpush1.bf16.msra.mxu0 %v457_v2  ;;  %v466_v8 = vld [vmem:[#allocation5 + $0x30] ss:$8 sps:$4 sm:$0xff]   ;;  %v467_v9 = vld [vmem:[#allocation5 + $0x44] ss:$8 sps:$4 sm:$0xff]   ;;  %v469_v10 = vld [vmem:[#allocation5 + $0x40] ss:$8 sps:$4 sm:$0xff]  }
  0x2a   :  { %157 = vmatprep.subr.bf16.mxu0 %v458_v3  ;;  %v470_v11 = vld [vmem:[#allocation5 + $0x54] ss:$8 sps:$4 sm:$0xff]   ;;  %v472_v12 = vld [vmem:[#allocation5 + $0x50] ss:$8 sps:$4 sm:$0xff]   ;;  %v473_v13 = vld [vmem:[#allocation5 + $0x64] ss:$8 sps:$4 sm:$0xff]  }
  0x2b   :  { %v475_v14 = vld [vmem:[#allocation5 + $0x60] ss:$8 sps:$4 sm:$0xff]   ;;  %v476_v15 = vld [vmem:[#allocation5 + $0x74] ss:$8 sps:$4 sm:$0xff]   ;;  %v478_v16 = vld [vmem:[#allocation5 + $0x70] ss:$8 sps:$4 sm:$0xff]  }
  0x2c   :  { %v649_v18 = vld [vmem:[#allocation2 + $0x8] sm:$0xff]  ;;  %v479_v20 = vld [vmem:[#allocation5 + $0x84] ss:$8 sps:$4 sm:$0xff]   ;;  %v481_v21 = vld [vmem:[#allocation5 + $0x80] ss:$8 sps:$4 sm:$0xff]   ;;  %v66_v37 = vshrl.u32 %v65_v36, 7 }
  0x2d   :  { %158 = vmatpush1.bf16.msra.mxu0 %v460_v4  ;;  %v63_v19 = vpack.c.bf16 %v649_v18, %v647_v17  ;;  %329 = vmatprep.subr.bf16.mxu1 %v479_v20  ;;  %v482_v22 = vld [vmem:[#allocation5 + $0x94] ss:$8 sps:$4 sm:$0xff]   ;;  %v484_v23 = vld [vmem:[#allocation5 + $0x90] ss:$8 sps:$4 sm:$0xff]   ;;  %v485_v24 = vld [vmem:[#allocation5 + $0xa4] ss:$8 sps:$4 sm:$0xff]  }
  0x2e   :  { %159 = vmatprep.subr.bf16.mxu0 %v461_v5  ;;  %330 = vmatpush1.bf16.msra.mxu1 %v481_v21  ;;  %v487_v25 = vld [vmem:[#allocation5 + $0xa0] ss:$8 sps:$4 sm:$0xff]   ;;  %v488_v26 = vld [vmem:[#allocation5 + $0xb4] ss:$8 sps:$4 sm:$0xff]   ;;  %v490_v27 = vld [vmem:[#allocation5 + $0xb0] ss:$8 sps:$4 sm:$0xff]  }
  0x2f   :  { %331 = vmatprep.subr.bf16.mxu1 %v482_v22  ;;  %v491_v28 = vld [vmem:[#allocation5 + $0xc4] ss:$8 sps:$4 sm:$0xff]   ;;  %v493_v29 = vld [vmem:[#allocation5 + $0xc0] ss:$8 sps:$4 sm:$0xff]   ;;  %v494_v30 = vld [vmem:[#allocation5 + $0xd4] ss:$8 sps:$4 sm:$0xff]  }
  0x30   :  { %v496_v31 = vld [vmem:[#allocation5 + $0xd0] ss:$8 sps:$4 sm:$0xff]   ;;  %v497_v32 = vld [vmem:[#allocation5 + $0xe4] ss:$8 sps:$4 sm:$0xff]   ;;  %v499_v33 = vld [vmem:[#allocation5 + $0xe0] ss:$8 sps:$4 sm:$0xff]  }
  0x31   :  { %160 = vmatpush1.bf16.msra.mxu0 %v463_v6  ;;  %v500_v34 = vld [vmem:[#allocation5 + $0xf4] ss:$8 sps:$4 sm:$0xff]   ;;  %v502_v35 = vld [vmem:[#allocation5 + $0xf0] ss:$8 sps:$4 sm:$0xff]   ;;  %v71_v38 = vsub.s32 1, %v66_v37  ;;  %v67_v49 = vsub.s32 0, %v66_v37 }
  0x32   :  { %161 = vmatprep.subr.bf16.mxu0 %v464_v7  ;;  %332 = vmatpush1.bf16.msra.mxu1 %v484_v23  ;;  %v62_v39 = vld [vmem:[%s678_s2] sm:$0x3]  ;;  %v430_v4 = vld [vmem:[%s678_s2 + $0x2] sm:$0x3]  ;;  %s596_s2 = smov [#allocation7]  }
  0x33   :  { %333 = vmatprep.subr.bf16.mxu1 %v485_v24  ;;  %v72_v40 = vrot.slane %v62_v39, %v71_v38  ;;  %v68_v51 = vrot.slane %v62_v39, %v67_v49  ;;  %v246_v5 = vrot.slane %v430_v4, %v71_v38  ;;  %s399_s13 = sshll.u32 %s596_s2, 4  ;;  %s400_s13 = int_to_ptr.vmem [resolvable:$true] %s399_s13 }
  0x34   :  { %s563_s14 = scalar_lea.vmem %s400_s13, 256  ;;  %p568_p3 = scmp.lt.s32.totalorder %s400_s13, %s400_s13 }
  0x35   :  { %162 = vmatpush1.bf16.msra.mxu0 %v466_v8  ;;  %p564_p2 = scmp.ne.s32.totalorder %s400_s13, %s563_s14  ;;  %p569_p4 = scmp.lt.s32.totalorder %s563_s14, %s563_s14 }
  0x36   :  { %163 = vmatprep.subr.bf16.mxu0 %v467_v9  ;;  %334 = vmatpush1.bf16.msra.mxu1 %v487_v25 }
  0x37   :  { %335 = vmatprep.subr.bf16.mxu1 %v488_v26  ;;  %p570_p5 = por %p569_p4, %p568_p3 }
  0x39   :  { %164 = vmatpush1.bf16.msra.mxu0 %v469_v10  ;;  %p571_p6 = pnand %p570_p5, %p564_p2 }
  0x3a   :  { %165 = vmatprep.subr.bf16.mxu0 %v470_v11  ;;  %336 = vmatpush1.bf16.msra.mxu1 %v490_v27 }
  0x3b   :  { %337 = vmatprep.subr.bf16.mxu1 %v491_v28 }
  0x3d   :  { %166 = vmatpush1.bf16.msra.mxu0 %v472_v12 }
  0x3e   :  { %167 = vmatprep.subr.bf16.mxu0 %v473_v13  ;;  %338 = vmatpush1.bf16.msra.mxu1 %v493_v29 }
  0x3f   :  { %339 = vmatprep.subr.bf16.mxu1 %v494_v30 }
  0x41   :  { %168 = vmatpush1.bf16.msra.mxu0 %v475_v14 }
  0x42   :  { %169 = vmatprep.subr.bf16.mxu0 %v476_v15  ;;  %340 = vmatpush1.bf16.msra.mxu1 %v496_v31  ;;  %v242_v15 = vrot.slane %v430_v4, %v67_v49 }
  0x43   :  { %341 = vmatprep.subr.bf16.mxu1 %v497_v32 }
  0x45   :  { %170 = vmatpush1.bf16.msra.mxu0 %v478_v16 }
  0x46   :  { %342 = vmatpush1.bf16.msra.mxu1 %v499_v33 }
  0x47   :  { %343 = vmatprep.subr.bf16.mxu1 %v500_v34 }
  0x48   :  { %188 = vmatmul.mubr.bf16.vlgmr.msra.gmra.mrb[0].mxu0 %v63_v19 }
  0x4a   :  { %344 = vmatpush1.bf16.msra.mxu1 %v502_v35 }
 0x11b   :  { %v189_v41 = vpop.f32.mrb[0].mxu0 }
 0x11c   :  { %v191_v42 = vpop.f32.mrb[1].mxu0  ;;  %v190_v55 = vadd.f32 %v189_v41, %v68_v51 }
 0x11d   :  { %v192_v43 = vadd.f32 %v191_v42, %v72_v40  ;;  %v193_v44 = vpop.f32.mrb[2].mxu0 }
 0x11e   :  { %v195_v45 = vpop.f32.mrb[3].mxu0  ;;  %v194_v56 = vadd.f32 %v193_v44, %v68_v51  ;;  %v198_v57 = vmax.f32 %v190_v55, 0.0 }
 0x11f   :  { %v428_v46 = vmul.f32 -1.442695, %v192_v43  ;;  %v196_v47 = vadd.f32 %v195_v45, %v72_v40 }
 0x120   :  { %v199_v58 = vmax.f32 %v194_v56, 0.0  ;;  %v212_v59 = vsub.f32 %v647_v17, %v198_v57 }
 0x121   :  { %503 = vpow2.f32 %v428_v46  ;;  %v429_v48 = vmul.f32 -1.442695, %v196_v47 }
 0x122   :  { %v213_v61 = vsub.f32 %v649_v18, %v199_v58 }
 0x123   :  { %505 = vpow2.f32 %v429_v48 }
 0x12b   :  { %v504_v50 = vpop.eup %503 }
 0x12c   :  { %v206_v52 = vadd.f32 1.0, %v504_v50 }
 0x12d   :  { %v506_v53 = vpop.eup %505 }
 0x12e   :  { %507 = vrcp.f32 %v206_v52  ;;  %v207_v54 = vadd.f32 1.0, %v506_v53 }
 0x130   :  { %509 = vrcp.f32 %v207_v54 }
 0x138   :  { %v508_v60 = vpop.eup %507 }
 0x139   :  { %v214_v62 = vmul.f32 %v508_v60, %v212_v59 }
 0x13a   :  { %v510_v63 = vpop.eup %509 }
 0x13b   :  { %v215_v0 = vmul.f32 %v510_v63, %v213_v61  ;;  %v216_v1 = vadd.f32 %v214_v62, %v198_v57 }
 0x13d   :  { %v217_v2 = vadd.f32 %v215_v0, %v199_v58 }
 0x13f   :  { %v237_v3 = vpack.c.bf16 %v217_v2, %v216_v1 }
 0x141   :  { %362 = vmatmul.mubr.bf16.vlgmr.msra.gmra.mrb[0].mxu1 %v237_v3 }
 0x214   :  { %v363_v6 = vpop.f32.mrb[0].mxu1 }
 0x215   :  { %v365_v7 = vpop.f32.mrb[1].mxu1  ;;  %v364_v19 = vadd.f32 %v363_v6, %v242_v15 }
 0x216   :  { %v366_v8 = vadd.f32 %v365_v7, %v246_v5  ;;  %v367_v9 = vpop.f32.mrb[2].mxu1 }
 0x217   :  { %v369_v10 = vpop.f32.mrb[3].mxu1  ;;  %v368_v20 = vadd.f32 %v367_v9, %v242_v15  ;;  %v372_v21 = vmax.f32 %v364_v19, 0.0 }
 0x218   :  { %v447_v11 = vmul.f32 -1.442695, %v366_v8  ;;  %v370_v12 = vadd.f32 %v369_v10, %v246_v5 }
 0x219   :  { %v373_v22 = vmax.f32 %v368_v20, 0.0  ;;  %v386_v23 = vsub.f32 %v216_v1, %v372_v21 }
 0x21a   :  { %511 = vpow2.f32 %v447_v11  ;;  %v448_v13 = vmul.f32 -1.442695, %v370_v12 }
 0x21b   :  { %v387_v25 = vsub.f32 %v217_v2, %v373_v22 }
 0x21c   :  { %513 = vpow2.f32 %v448_v13 }
 0x224   :  { %v512_v14 = vpop.eup %511 }
 0x225   :  { %v380_v16 = vadd.f32 1.0, %v512_v14 }
 0x226   :  { %v514_v17 = vpop.eup %513 }
 0x227   :  { %515 = vrcp.f32 %v380_v16  ;;  %v381_v18 = vadd.f32 1.0, %v514_v17 }
 0x229   :  { %517 = vrcp.f32 %v381_v18 }
 0x231   :  { %v516_v24 = vpop.eup %515 }
 0x232   :  { %v388_v26 = vmul.f32 %v516_v24, %v386_v23 }
 0x233   :  { %v518_v27 = vpop.eup %517 }
 0x234   :  { %v389_v28 = vmul.f32 %v518_v27, %v387_v25  ;;  %v390_v29 = vadd.f32 %v388_v26, %v372_v21 }
 0x236   :  { %v391_v30 = vadd.f32 %v389_v28, %v373_v22  ;;  %392 = vst [vmem:[#allocation7] sm:$0xff] %v390_v29 }
 0x238   :  { %393 = vst [vmem:[#allocation7 + $0x8] sm:$0xff] %v391_v30 }
 0x239   :  { %574 = shalt.err (!%p571_p6)
}
 0x23a   :  { %s575_s17 = scalar_lea.hbm %s679_s3, 256 }
 0x23b   :  { %p576_p7 = scmp.ne.s32.totalorder %s679_s3, %s575_s17  ;;  %p579_p8 = scmp.lt.u32.totalorder %s575_s17, %s679_s3 }
 0x23d   :  { %p581_p9 = pnand %p579_p8, %p576_p7 }
 0x23f   :  { %584 = shalt.err (!%p581_p9)
}
 0x240   :  { %405 = dma.vmem_to_hbm [thread:$0]  %s400_s13, 256, %s679_s3, [#allocation4], %s592_s22, %s592_s22, %s593_s23  }
 0x241   :  { %589 = dma.done.wait [#allocation4], 256  }
 0x242   :  { %590 = vsyncadd [#allocation4], 4294967040 }
 0x243   :  { %409 = vsyncpa [#allocation3], 1 }
 0x244   :  { %410 = vsyncpa [#allocation6], 1 }
 0x245   :  { %411 = vsyncpa [#allocation4], 1 }

</bundles_post_ra>
